<compile_context>
chip_gen: v7x
topology: tpu7x:2x2x1
jax: 0.10.0
libtpu: 0.0.40
codegen_flags: <defaults>
</compile_context>

<pallas_src>
import jax
import jax.numpy as jnp
from jax.experimental import pallas as pl
from jax.experimental.pallas import tpu as pltpu


def fft_conv_kernel(x_ref, halo_ref, w1_ref, b1_ref, w2_ref, b2_ref,
                    gamma_ref, beta_ref, o_ref, xw_ref, xcat_ref):
    # x_ref:    (1, Tt, D)         time tile of the input (also residual path)
    # halo_ref: (1, 1, 2*HALO, D)  rows just before / after this tile
    #                              (zeroed at the sequence ends by the wrapper)
    # w1_ref:   (K*D, H) bf16      conv1 weights, tap-major folded
    # b1_ref:   (1, H)   f32
    # w2_ref:   (H, D)   bf16      1x1 conv == dense
    # b2_ref:   (1, D)   f32
    # gamma_ref/beta_ref: (1, D)   f32 LayerNorm affine params
    # o_ref:    (1, Tt, D)
    # xw_ref:   (Tt + 2*HALO, D) f32  scratch: halo-extended tile
    # xcat_ref: (Tt, K*D) bf16        scratch: K shifted views, folded
    Tt = x_ref.shape[1]
    D = x_ref.shape[2]
    K = xcat_ref.shape[1] // D
    pad = (K - 1) // 2
    halo = halo_ref.shape[2] // 2

    # ---- assemble the halo-extended tile (aligned sublane stores only) ----
    xw_ref[0:halo, :] = halo_ref[0, 0, 0:halo, :].astype(jnp.float32)
    xw_ref[halo:halo + Tt, :] = x_ref[0].astype(jnp.float32)
    xw_ref[halo + Tt:2 * halo + Tt, :] = (
        halo_ref[0, 0, halo:2 * halo, :].astype(jnp.float32))
    xw = xw_ref[...]

    # ---- fold the K taps: xcat[:, j*D:(j+1)*D] = x[t + j - pad]  (bf16) ----
    for j in range(K):                       # K is small & static -> unrolled
        s = halo - pad + j
        xcat_ref[:, j * D:(j + 1) * D] = xw[s:s + Tt, :].astype(xcat_ref.dtype)

    # conv1 (+ bias, ReLU): one deep bf16 matmul, f32 accumulation on the MXU
    hidden = jnp.dot(xcat_ref[...], w1_ref[...],
                     preferred_element_type=jnp.float32)            # (Tt, H)
    hidden = jnp.maximum(hidden + b1_ref[...], 0.0)

    # conv2 (kernel_size=1) == dense: bf16 inputs, f32 accumulation
    out = jnp.dot(hidden.astype(w2_ref.dtype), w2_ref[...],
                  preferred_element_type=jnp.float32) + b2_ref[...]  # (Tt, D)

    # dropout (eval) -> identity; residual add; LayerNorm (one-pass stats, f32)
    y = x_ref[0].astype(jnp.float32) + out
    s1 = jnp.sum(y, axis=-1, keepdims=True)
    s2 = jnp.sum(y * y, axis=-1, keepdims=True)
    mean = s1 * (1.0 / D)
    var = s2 * (1.0 / D) - mean * mean           # biased var, like nn.LayerNorm
    y_hat = (y - mean) * jax.lax.rsqrt(var + 1e-5)
    o_ref[0] = (y_hat * gamma_ref[...] + beta_ref[...]).astype(o_ref.dtype)


def fft_convolution(x, w1, b1, w2, b2, gamma, beta, kernel_size, *, t_tile=None):
    """x: (B, T, d_model). Weights in PyTorch Conv1d layout:
       w1: (d_hidden, d_model, k), w2: (d_model, d_hidden, 1)."""
    B, T, D = x.shape
    H = w1.shape[0]
    K = kernel_size
    assert K % 2 == 1, "odd kernel_size keeps output length == T"
    pad = (K - 1) // 2

    if t_tile is None:
        t_tile = min(T, 256)          # 256-512 is a good production choice
    assert T % t_tile == 0 and t_tile % 8 == 0
    n_t = T // t_tile
    halo = max(8, -(-pad // 8) * 8)   # sublane-aligned halo, >= conv pad
    assert pad <= halo <= t_tile

    # Tiny halo side-array: for tile t, the `halo` rows before the tile and the
    # `halo` rows after it (zeros where they fall outside the sequence).
    starts = jnp.arange(n_t) * t_tile
    idx = jnp.concatenate(
        [starts[:, None] + jnp.arange(-halo, 0)[None, :],
         starts[:, None] + t_tile + jnp.arange(0, halo)[None, :]], axis=1)
    valid = (idx >= 0) & (idx < T)
    halo_arr = jnp.where(valid[None, :, :, None],
                         jnp.take(x, jnp.clip(idx, 0, T - 1), axis=1),
                         jnp.zeros((), x.dtype))          # (B, nT, 2*halo, D)

    # Weights: PyTorch Conv1d layout -> tap-major folded, bf16 for the MXU.
    w1_fold = jnp.transpose(w1, (2, 1, 0)).reshape(K * D, H).astype(jnp.bfloat16)
    w2_mat = jnp.transpose(w2[:, :, 0], (1, 0)).astype(jnp.bfloat16)   # (H, D)
    b1_2d = b1.reshape(1, H).astype(jnp.float32)
    b2_2d = b2.reshape(1, D).astype(jnp.float32)
    gamma_2d = gamma.reshape(1, D).astype(jnp.float32)
    beta_2d = beta.reshape(1, D).astype(jnp.float32)

    return pl.pallas_call(
        fft_conv_kernel,
        out_shape=jax.ShapeDtypeStruct((B, T, D), x.dtype),
        grid_spec=pltpu.PrefetchScalarGridSpec(
            num_scalar_prefetch=0,
            grid=(B, n_t),
            in_specs=[
                pl.BlockSpec((1, t_tile, D), lambda b, t: (b, t, 0)),        # x tile
                pl.BlockSpec((1, 1, 2 * halo, D), lambda b, t: (b, t, 0, 0)),  # halo
                pl.BlockSpec((K * D, H), lambda b, t: (0, 0)),   # w1 (resident)
                pl.BlockSpec((1, H), lambda b, t: (0, 0)),       # b1
                pl.BlockSpec((H, D), lambda b, t: (0, 0)),       # w2 (resident)
                pl.BlockSpec((1, D), lambda b, t: (0, 0)),       # b2
                pl.BlockSpec((1, D), lambda b, t: (0, 0)),       # gamma
                pl.BlockSpec((1, D), lambda b, t: (0, 0)),       # beta
            ],
            out_specs=pl.BlockSpec((1, t_tile, D), lambda b, t: (b, t, 0)),
            scratch_shapes=[
                pltpu.VMEM((t_tile + 2 * halo, D), jnp.float32),   # xw
                pltpu.VMEM((t_tile, K * D), jnp.bfloat16),         # folded taps
            ],
        ),
        compiler_params=pltpu.CompilerParams(
            dimension_semantics=("parallel", "parallel"),
            vmem_limit_bytes=64 * 1024 * 1024,     # explicit budget (v7x-safe)
        ),
    )(x, halo_arr, w1_fold, b1_2d, w2_mat, b2_2d, gamma_2d, beta_2d)


def ref_forward(x, w1, b1, w2, b2, gamma, beta, kernel_size):
    """Pure-JAX reference mirroring the kernel's precision choices
    (bf16 matmul inputs, f32 accumulation / elementwise), via XLA convs."""
    pad = (kernel_size - 1) // 2
    xt = jnp.transpose(x, (0, 2, 1)).astype(jnp.bfloat16)   # (B, D, T), NCW
    h = jax.lax.conv_general_dilated(
        xt, w1.astype(jnp.bfloat16), (1,), [(pad, pad)],
        dimension_numbers=("NCH", "OIH", "NCH"),
        preferred_element_type=jnp.float32) + b1[None, :, None]
    h = jnp.maximum(h, 0.0)
    o = jax.lax.conv_general_dilated(
        h.astype(jnp.bfloat16), w2.astype(jnp.bfloat16), (1,), [(0, 0)],
        dimension_numbers=("NCH", "OIH", "NCH"),
        preferred_element_type=jnp.float32) + b2[None, :, None]
    y = x + jnp.transpose(o, (0, 2, 1))          # dropout (eval) == identity
    mean = jnp.mean(y, axis=-1, keepdims=True)
    var = jnp.mean((y - mean) ** 2, axis=-1, keepdims=True)
    return (y - mean) / jnp.sqrt(var + 1e-5) * gamma + beta


if __name__ == "__main__":
    # Lane-dense small demo shapes (D, H multiples of 128; T tiled by 16).
    B, T, D, H, K = 2, 32, 128, 256, 3

    key = jax.random.PRNGKey(0)
    kx, k1, kb1, k2, kb2, kg, kb = jax.random.split(key, 7)
    x = jax.random.normal(kx, (B, T, D), jnp.float32)
    # PyTorch Conv1d weight layout: (out_channels, in_channels, kernel_size)
    w1 = jax.random.normal(k1, (H, D, K), jnp.float32) * 0.05
    b1 = jax.random.normal(kb1, (H,), jnp.float32) * 0.1
    w2 = jax.random.normal(k2, (D, H, 1), jnp.float32) * 0.05
    b2 = jax.random.normal(kb2, (D,), jnp.float32) * 0.1
    gamma = 1.0 + 0.1 * jax.random.normal(kg, (D,), jnp.float32)
    beta = 0.1 * jax.random.normal(kb, (D,), jnp.float32)

    out = fft_convolution(x, w1, b1, w2, b2, gamma, beta, K, t_tile=16)
    out = jax.block_until_ready(out)

    ref = ref_forward(x, w1, b1, w2, b2, gamma, beta, K)
    assert out.shape == (B, T, D)
    max_err = float(jnp.max(jnp.abs(out - ref)))
    assert jnp.allclose(out, ref, atol=2e-2, rtol=2e-2), max_err
    print("KERNEL_OK")
</pallas_src>

<mosaic_0001>
module attributes {stable_mosaic.version = 11 : i64} {
  func.func @fft_conv_kernel(%arg0: i32, %arg1: i32, %arg2: memref<1x16x128xf32, #tpu.memory_space<vmem>>, %arg3: memref<1x1x16x128xf32, #tpu.memory_space<vmem>>, %arg4: memref<384x256xbf16, #tpu.memory_space<vmem>>, %arg5: memref<1x256xf32, #tpu.memory_space<vmem>>, %arg6: memref<256x128xbf16, #tpu.memory_space<vmem>>, %arg7: memref<1x128xf32, #tpu.memory_space<vmem>>, %arg8: memref<1x128xf32, #tpu.memory_space<vmem>>, %arg9: memref<1x128xf32, #tpu.memory_space<vmem>>, %arg10: memref<1x16x128xf32, #tpu.memory_space<vmem>>, %arg11: memref<32x128xf32, #tpu.memory_space<vmem>>, %arg12: memref<16x384xbf16, #tpu.memory_space<vmem>>) attributes {dimension_semantics = [#tpu.dimension_semantics<parallel>, #tpu.dimension_semantics<parallel>], iteration_bounds = array<i64: 2, 2>, scalar_prefetch = 0 : i64, scratch_operands = 2 : i64, tpu.core_type = #tpu.core_type<tc>, window_params = [{transform_indices = @transform_0, window_bounds = array<i64: 1, 16, 128>}, {transform_indices = @transform_1, window_bounds = array<i64: 1, 1, 16, 128>}, {pipeline_mode = #tpu.pipeline_mode<synchronous>, transform_indices = @transform_2, window_bounds = array<i64: 384, 256>}, {pipeline_mode = #tpu.pipeline_mode<synchronous>, transform_indices = @transform_3, window_bounds = array<i64: 1, 256>}, {pipeline_mode = #tpu.pipeline_mode<synchronous>, transform_indices = @transform_4, window_bounds = array<i64: 256, 128>}, {pipeline_mode = #tpu.pipeline_mode<synchronous>, transform_indices = @transform_5, window_bounds = array<i64: 1, 128>}, {pipeline_mode = #tpu.pipeline_mode<synchronous>, transform_indices = @transform_6, window_bounds = array<i64: 1, 128>}, {pipeline_mode = #tpu.pipeline_mode<synchronous>, transform_indices = @transform_7, window_bounds = array<i64: 1, 128>}, {transform_indices = @transform_8, window_bounds = array<i64: 1, 16, 128>}]} {
    %c0 = arith.constant 0 : index
    %c0_0 = arith.constant 0 : index
    %c0_1 = arith.constant 0 : index
    %c0_2 = arith.constant 0 : index
    %0 = vector.load %arg3[%c0, %c0_0, %c0_1, %c0_2] : memref<1x1x16x128xf32, #tpu.memory_space<vmem>>, vector<1x1x8x128xf32>
    %1 = vector.shape_cast %0 : vector<1x1x8x128xf32> to vector<8x128xf32>
    %c0_3 = arith.constant 0 : index
    %c0_4 = arith.constant 0 : index
    %2 = vector.load %arg11[%c0_3, %c0_4] : memref<32x128xf32, #tpu.memory_space<vmem>>, vector<8x128xf32>
    tpu.vector_store %arg11[%c0_3, %c0_4], %1 {strides = array<i32>} : memref<32x128xf32, #tpu.memory_space<vmem>>, vector<8x128xf32>,
    %c0_5 = arith.constant 0 : index
    %c0_6 = arith.constant 0 : index
    %c0_7 = arith.constant 0 : index
    %3 = vector.load %arg2[%c0_5, %c0_6, %c0_7] : memref<1x16x128xf32, #tpu.memory_space<vmem>>, vector<1x16x128xf32>
    %4 = vector.shape_cast %3 : vector<1x16x128xf32> to vector<16x128xf32>
    %c8 = arith.constant 8 : index
    %c0_8 = arith.constant 0 : index
    %5 = vector.load %arg11[%c8, %c0_8] : memref<32x128xf32, #tpu.memory_space<vmem>>, vector<16x128xf32>
    tpu.vector_store %arg11[%c8, %c0_8], %4 {strides = array<i32>} : memref<32x128xf32, #tpu.memory_space<vmem>>, vector<16x128xf32>,
    %c0_9 = arith.constant 0 : index
    %c0_10 = arith.constant 0 : index
    %c8_11 = arith.constant 8 : index
    %c0_12 = arith.constant 0 : index
    %6 = vector.load %arg3[%c0_9, %c0_10, %c8_11, %c0_12] : memref<1x1x16x128xf32, #tpu.memory_space<vmem>>, vector<1x1x8x128xf32>
    %7 = vector.shape_cast %6 : vector<1x1x8x128xf32> to vector<8x128xf32>
    %c24 = arith.constant 24 : index
    %c0_13 = arith.constant 0 : index
    %8 = vector.load %arg11[%c24, %c0_13] : memref<32x128xf32, #tpu.memory_space<vmem>>, vector<8x128xf32>
    tpu.vector_store %arg11[%c24, %c0_13], %7 {strides = array<i32>} : memref<32x128xf32, #tpu.memory_space<vmem>>, vector<8x128xf32>,
    %c0_14 = arith.constant 0 : index
    %c0_15 = arith.constant 0 : index
    %9 = vector.load %arg11[%c0_14, %c0_15] : memref<32x128xf32, #tpu.memory_space<vmem>>, vector<32x128xf32>
    %10 = vector.extract_strided_slice %9 {offsets = [7, 0], sizes = [16, 128], strides = [1, 1]} : vector<32x128xf32> to vector<16x128xf32>
    %11 = arith.truncf %10 : vector<16x128xf32> to vector<16x128xbf16>
    %c0_16 = arith.constant 0 : index
    %c0_17 = arith.constant 0 : index
    %12 = vector.load %arg12[%c0_16, %c0_17] : memref<16x384xbf16, #tpu.memory_space<vmem>>, vector<16x128xbf16>
    tpu.vector_store %arg12[%c0_16, %c0_17], %11 {strides = array<i32>} : memref<16x384xbf16, #tpu.memory_space<vmem>>, vector<16x128xbf16>,
    %13 = vector.extract_strided_slice %9 {offsets = [8, 0], sizes = [16, 128], strides = [1, 1]} : vector<32x128xf32> to vector<16x128xf32>
    %14 = arith.truncf %13 : vector<16x128xf32> to vector<16x128xbf16>
    %c0_18 = arith.constant 0 : index
    %c128 = arith.constant 128 : index
    %15 = vector.load %arg12[%c0_18, %c128] : memref<16x384xbf16, #tpu.memory_space<vmem>>, vector<16x128xbf16>
    tpu.vector_store %arg12[%c0_18, %c128], %14 {strides = array<i32>} : memref<16x384xbf16, #tpu.memory_space<vmem>>, vector<16x128xbf16>,
    %16 = vector.extract_strided_slice %9 {offsets = [9, 0], sizes = [16, 128], strides = [1, 1]} : vector<32x128xf32> to vector<16x128xf32>
    %17 = arith.truncf %16 : vector<16x128xf32> to vector<16x128xbf16>
    %c0_19 = arith.constant 0 : index
    %c256 = arith.constant 256 : index
    %18 = vector.load %arg12[%c0_19, %c256] : memref<16x384xbf16, #tpu.memory_space<vmem>>, vector<16x128xbf16>
    tpu.vector_store %arg12[%c0_19, %c256], %17 {strides = array<i32>} : memref<16x384xbf16, #tpu.memory_space<vmem>>, vector<16x128xbf16>,
    %c0_20 = arith.constant 0 : index
    %c0_21 = arith.constant 0 : index
    %19 = vector.load %arg12[%c0_20, %c0_21] : memref<16x384xbf16, #tpu.memory_space<vmem>>, vector<16x384xbf16>
    %c0_22 = arith.constant 0 : index
    %c0_23 = arith.constant 0 : index
    %20 = vector.load %arg4[%c0_22, %c0_23] : memref<384x256xbf16, #tpu.memory_space<vmem>>, vector<384x256xbf16>
    %cst = arith.constant dense<0.000000e+00> : vector<16x256xf32>
    %21 = tpu.matmul %19, %20, %cst {dimension_numbers = #tpu.dot_dimension_numbers<[1], [0], [0], [1], [0, 0, 1, 1], [], []>} : vector<16x384xbf16>, vector<384x256xbf16>, vector<16x256xf32> -> vector<16x256xf32>
    %c0_24 = arith.constant 0 : index
    %c0_25 = arith.constant 0 : index
    %22 = vector.load %arg5[%c0_24, %c0_25] : memref<1x256xf32, #tpu.memory_space<vmem>>, vector<1x256xf32>
    %23 = vector.broadcast %22 : vector<1x256xf32> to vector<16x256xf32>
    %24 = arith.addf %21, %23 : vector<16x256xf32>
    %cst_26 = arith.constant 0.000000e+00 : f32
    %25 = vector.broadcast %cst_26 : f32 to vector<16x256xf32>
    %26 = arith.maximumf %24, %25 : vector<16x256xf32>
    %27 = arith.truncf %26 : vector<16x256xf32> to vector<16x256xbf16>
    %c0_27 = arith.constant 0 : index
    %c0_28 = arith.constant 0 : index
    %28 = vector.load %arg6[%c0_27, %c0_28] : memref<256x128xbf16, #tpu.memory_space<vmem>>, vector<256x128xbf16>
    %cst_29 = arith.constant dense<0.000000e+00> : vector<16x128xf32>
    %29 = tpu.matmul %27, %28, %cst_29 {dimension_numbers = #tpu.dot_dimension_numbers<[1], [0], [0], [1], [0, 0, 1, 1], [], []>} : vector<16x256xbf16>, vector<256x128xbf16>, vector<16x128xf32> -> vector<16x128xf32>
    %c0_30 = arith.constant 0 : index
    %c0_31 = arith.constant 0 : index
    %30 = vector.load %arg7[%c0_30, %c0_31] : memref<1x128xf32, #tpu.memory_space<vmem>>, vector<1x128xf32>
    %31 = vector.broadcast %30 : vector<1x128xf32> to vector<16x128xf32>
    %32 = arith.addf %29, %31 : vector<16x128xf32>
    %c0_32 = arith.constant 0 : index
    %c0_33 = arith.constant 0 : index
    %c0_34 = arith.constant 0 : index
    %33 = vector.load %arg2[%c0_32, %c0_33, %c0_34] : memref<1x16x128xf32, #tpu.memory_space<vmem>>, vector<1x16x128xf32>
    %34 = vector.shape_cast %33 : vector<1x16x128xf32> to vector<16x128xf32>
    %35 = arith.addf %34, %32 : vector<16x128xf32>
    %cst_35 = arith.constant dense<0.000000e+00> : vector<16xf32>
    %36 = vector.multi_reduction <add>, %35, %cst_35 [1] : vector<16x128xf32> to vector<16xf32>
    %37 = vector.shape_cast %36 : vector<16xf32> to vector<16x1xf32>
    %38 = arith.mulf %35, %35 : vector<16x128xf32>
    %cst_36 = arith.constant dense<0.000000e+00> : vector<16xf32>
    %39 = vector.multi_reduction <add>, %38, %cst_36 [1] : vector<16x128xf32> to vector<16xf32>
    %40 = vector.shape_cast %39 : vector<16xf32> to vector<16x1xf32>
    %cst_37 = arith.constant 7.812500e-03 : f32
    %41 = vector.broadcast %cst_37 : f32 to vector<16x1xf32>
    %42 = arith.mulf %37, %41 : vector<16x1xf32>
    %cst_38 = arith.constant 7.812500e-03 : f32
    %43 = vector.broadcast %cst_38 : f32 to vector<16x1xf32>
    %44 = arith.mulf %40, %43 : vector<16x1xf32>
    %45 = arith.mulf %42, %42 : vector<16x1xf32>
    %46 = arith.subf %44, %45 : vector<16x1xf32>
    %47 = vector.broadcast %42 : vector<16x1xf32> to vector<16x128xf32>
    %48 = arith.subf %35, %47 : vector<16x128xf32>
    %cst_39 = arith.constant 9.99999974E-6 : f32
    %49 = vector.broadcast %cst_39 : f32 to vector<16x1xf32>
    %50 = arith.addf %46, %49 : vector<16x1xf32>
    %51 = math.rsqrt %50 : vector<16x1xf32>
    %52 = vector.broadcast %51 : vector<16x1xf32> to vector<16x128xf32>
    %53 = arith.mulf %48, %52 : vector<16x128xf32>
    %c0_40 = arith.constant 0 : index
    %c0_41 = arith.constant 0 : index
    %54 = vector.load %arg8[%c0_40, %c0_41] : memref<1x128xf32, #tpu.memory_space<vmem>>, vector<1x128xf32>
    %55 = vector.broadcast %54 : vector<1x128xf32> to vector<16x128xf32>
    %56 = arith.mulf %53, %55 : vector<16x128xf32>
    %c0_42 = arith.constant 0 : index
    %c0_43 = arith.constant 0 : index
    %57 = vector.load %arg9[%c0_42, %c0_43] : memref<1x128xf32, #tpu.memory_space<vmem>>, vector<1x128xf32>
    %58 = vector.broadcast %57 : vector<1x128xf32> to vector<16x128xf32>
    %59 = arith.addf %56, %58 : vector<16x128xf32>
    %c0_44 = arith.constant 0 : index
    %c0_45 = arith.constant 0 : index
    %c0_46 = arith.constant 0 : index
    %60 = vector.load %arg10[%c0_44, %c0_45, %c0_46] : memref<1x16x128xf32, #tpu.memory_space<vmem>>, vector<1x16x128xf32>
    %61 = vector.shape_cast %60 : vector<1x16x128xf32> to vector<16x128xf32>
    %62 = vector.shape_cast %59 : vector<16x128xf32> to vector<1x16x128xf32>
    tpu.vector_store %arg10[%c0_44, %c0_45, %c0_46], %62 {strides = array<i32>} : memref<1x16x128xf32, #tpu.memory_space<vmem>>, vector<1x16x128xf32>,
    return
  }
  func.func @transform_0(%arg0: i32, %arg1: i32) -> (i32, i32, i32) {
    %c0_i32 = arith.constant 0 : i32
    %c0_i32_0 = arith.constant 0 : i32
    return %arg0, %arg1, %c0_i32 : i32, i32, i32
  }
  func.func @transform_1(%arg0: i32, %arg1: i32) -> (i32, i32, i32, i32) {
    %c0_i32 = arith.constant 0 : i32
    %c0_i32_0 = arith.constant 0 : i32
    %c0_i32_1 = arith.constant 0 : i32
    return %arg0, %arg1, %c0_i32, %c0_i32_0 : i32, i32, i32, i32
  }
  func.func @transform_2(%arg0: i32, %arg1: i32) -> (i32, i32) {
    %c0_i32 = arith.constant 0 : i32
    %c0_i32_0 = arith.constant 0 : i32
    %c0_i32_1 = arith.constant 0 : i32
    return %c0_i32, %c0_i32_0 : i32, i32
  }
  func.func @transform_3(%arg0: i32, %arg1: i32) -> (i32, i32) {
    %c0_i32 = arith.constant 0 : i32
    %c0_i32_0 = arith.constant 0 : i32
    %c0_i32_1 = arith.constant 0 : i32
    return %c0_i32, %c0_i32_0 : i32, i32
  }
  func.func @transform_4(%arg0: i32, %arg1: i32) -> (i32, i32) {
    %c0_i32 = arith.constant 0 : i32
    %c0_i32_0 = arith.constant 0 : i32
    %c0_i32_1 = arith.constant 0 : i32
    return %c0_i32, %c0_i32_0 : i32, i32
  }
  func.func @transform_5(%arg0: i32, %arg1: i32) -> (i32, i32) {
    %c0_i32 = arith.constant 0 : i32
    %c0_i32_0 = arith.constant 0 : i32
    %c0_i32_1 = arith.constant 0 : i32
    return %c0_i32, %c0_i32_0 : i32, i32
  }
  func.func @transform_6(%arg0: i32, %arg1: i32) -> (i32, i32) {
    %c0_i32 = arith.constant 0 : i32
    %c0_i32_0 = arith.constant 0 : i32
    %c0_i32_1 = arith.constant 0 : i32
    return %c0_i32, %c0_i32_0 : i32, i32
  }
  func.func @transform_7(%arg0: i32, %arg1: i32) -> (i32, i32) {
    %c0_i32 = arith.constant 0 : i32
    %c0_i32_0 = arith.constant 0 : i32
    %c0_i32_1 = arith.constant 0 : i32
    return %c0_i32, %c0_i32_0 : i32, i32
  }
  func.func @transform_8(%arg0: i32, %arg1: i32) -> (i32, i32, i32) {
    %c0_i32 = arith.constant 0 : i32
    %c0_i32_0 = arith.constant 0 : i32
    return %arg0, %arg1, %c0_i32 : i32, i32, i32
  }
}

</mosaic_0001>

<bundles_post_ra>
// kernel: tpu_custom_call.1
= control target key start
LH: loop header
LB: loop body
LE: loop exit
PB: predicated region body
PF: predicated region fallthrough
CT: control target
= control target key end

     0   :  { %s2561_s0 = inlined_call_operand.hbm [shape: f32[2,32,128], index: 0, kind: input, shape index: {}]   ;;  %s2562_s1 = inlined_call_operand.hbm [shape: f32[2,2,16,128], index: 1, kind: input, shape index: {}]   ;;  %s2563_s2 = inlined_call_operand.hbm [shape: bf16[384,256], index: 2, kind: input, shape index: {}]   ;;  %s2564_s3 = inlined_call_operand.hbm [shape: f32[1,256], index: 3, kind: input, shape index: {}]   ;;  %s2565_s4 = inlined_call_operand.hbm [shape: bf16[256,128], index: 4, kind: input, shape index: {}]   ;;  %s2566_s5 = inlined_call_operand.hbm [shape: f32[1,128], index: 5, kind: input, shape index: {}]   ;;  %s2567_s6 = inlined_call_operand.hbm [shape: f32[1,128], index: 6, kind: input, shape index: {}]   ;;  %s2568_s7 = inlined_call_operand.hbm [shape: f32[1,128], index: 7, kind: input, shape index: {}]   ;;  %s2569_s8 = inlined_call_operand.hbm [shape: f32[2,32,128], index: 8, kind: output, shape index: {}]  }
   0x1   :  { %2579 = sst [smem:[#allocation29_spill]] %s2561_s0 }
   0x2   :  { %2580 = sst [smem:[#allocation30_spill]] %s2563_s2 }
   0x3   :  { %2581 = sst [smem:[#allocation31_spill]] %s2564_s3 }
   0x4   :  { %2582 = sst [smem:[#allocation32_spill]] %s2565_s4 }
   0x5   :  { %2583 = sst [smem:[#allocation33_spill]] %s2566_s5 }
   0x6   :  { %2584 = sst [smem:[#allocation34_spill]] %s2567_s6 }
   0x7   :  { %2585 = sst [smem:[#allocation35_spill]] %s2569_s8 }
   0x8   :  { %13 = vsyncpa [#allocation5], 0 }
   0x9   :  { %15 = vsyncpa [#allocation5 + $0x1], 0 }
   0xa   :  { %16 = vsyncpa [#allocation8], 0 }
   0xb   :  { %18 = vsyncpa [#allocation8 + $0x1], 0 }
   0xc   :  { %19 = vsyncpa [#allocation11], 0 }
   0xd   :  { %20 = vsyncpa [#allocation14], 0 }
   0xe   :  { %21 = vsyncpa [#allocation17], 0 }
   0xf   :  { %22 = vsyncpa [#allocation6], 0 }
  0x10   :  { %24 = vsyncpa [#allocation6 + $0x1], 0  ;;  %s2113_s27 = smov 0   ;;  %s2115_s28 = smov 0  }
  0x11   :  { %s2117_s29 = smov 0   ;;  %s2119_s30 = smov 0  }
  0x12   :  { %s2121_s9 = smov 0   ;;  %s2123_s10 = smov 0  }
  0x13   :  { %s2125_s11 = smov 0   ;;  %s2127_s12 = smov 0  }
  0x14 LB: > { %2586 = sst [smem:[#allocation26_spill]] %s2034_s30  ;;  %s2154_s13 = sadd.s32 4294967295, %s2050_s12   ;;  %s2050_s12 = sphi %s2127_s12, %s30_s12   ;;  %s2046_s11 = sphi %s2125_s11, %s2627_s11   ;;  %s2042_s10 = sphi %s2123_s10, %s2626_s10   ;;  %s2038_s9 = sphi %s2121_s9, %s2625_s9   ;;  %s2034_s30 = sphi %s2119_s30, %s2624_s30   ;;  %s2030_s29 = sphi %s2117_s29, %s2623_s29   ;;  %s2026_s28 = sphi %s2115_s28, %s2622_s28   ;;  %s2022_s27 = sphi %s2113_s27, %s2621_s27  }
  0x15   : > { %2587 = sst [smem:[#allocation27_spill]] %s2038_s9  ;;  %p1332_p0 = scmp.ge.s32.totalorder %s2050_s12, 1 }
  0x16   : > { %p2572_p1 = scmp.eq.s32.totalorder %s2154_s13, 0  ;;  %p257_p2 = scmp.lt.s32.totalorder %s2050_s12, 5 }
  0x17   : > { %s2052_s15 = smov [#allocation9]   ;;  %s2053_s18 = smov [#allocation10]  }
  0x18   : > { %p2159_p3 = pnand %p1332_p0, %p257_p2  ;;  %s269_s16 = sshll.u32 %s2052_s15, 4  ;;  %s2163_s16 = int_to_ptr.vmem [resolvable:$true] %s269_s16 }
  0x19   : > { %s283_s19 = sshll.u32 %s2053_s18, 4  ;;  %s2054_s20 = smov [#allocation13]   ;;  %s2173_s19 = int_to_ptr.vmem [resolvable:$true] %s283_s19 }
  0x1a   : > { %s2588_s14 = scalar_select %p2159_p3, 1, 0 }
  0x1b   : > { %p1491_p4 = pneg %p2159_p3  ;;  %s2175_s21 = sshll.u32 %s2054_s20, 4  ;;  %s308_s21 = int_to_ptr.vmem [resolvable:$true] %s2175_s21 }
  0x1c   : > { %2589 = sst [smem:[#allocation28_spill]] %s2588_s14 }
  0x1d   : > { %p2169_p5 = pnand %p1491_p4, %p2572_p1  ;;  %s2591_s2 = sld [smem:[#allocation30_spill]] }
  0x1f   : > { %p2185_p7 = pneg %p2169_p5 }
  0x23   : > { %s1704_s24 = scalar_lea.hbm %s2591_s2, 6144 }
  0x24   : > { %p1705_p6 = scmp.ne.s32.totalorder %s2591_s2, %s1704_s24  ;;  %p1711_p10 = scmp.lt.u32.totalorder %s1704_s24, %s2591_s2 }
  0x26   : > { %p1707_p8 = pnand %p2185_p7, %p1705_p6 }
  0x28   : > { %p1708_p9 = pneg %p1707_p8 }
  0x2a   : > { %p1713_p11 = pnand %p1711_p10, %p1708_p9 }
  0x2c   : > { %1716 = shalt.err (!%p1713_p11)
}
  0x2d   : > { %s1717_s22 = scalar_lea.vmem %s2163_s16, 6144  ;;  %p1725_p2 = scmp.lt.s32.totalorder %s2163_s16, %s2163_s16 }
  0x2e   : > { %p1718_p12 = scmp.ne.s32.totalorder %s2163_s16, %s1717_s22  ;;  %p1726_p4 = scmp.lt.s32.totalorder %s1717_s22, %s1717_s22 }
  0x30   : > { %p1720_p13 = pnand %p1718_p12, %p2185_p7  ;;  %p1727_p6 = por %p1726_p4, %p1725_p2 }
  0x32   : > { %p1721_p0 = pneg %p1720_p13 }
  0x34   : > { %p1728_p8 = pnand %p1727_p6, %p1721_p0 }
  0x36   : > { %1731 = shalt.err (!%p1728_p8)
}
  0x37   : > { %s2574_s23 = smov 128   ;;  %s2576_s24 = smov 8  }
  0x38   : > { %1494 = dma.hbm_to_vmem [thread:$0]  (!%p2169_p5), %s2591_s2, 6144, %s2163_s16, [#allocation8], %s2574_s23, %s2574_s23, %s2576_s24  }
  0x39   : > { %s2593_s3 = sld [smem:[#allocation31_spill]] }
  0x3f   : > { %s1732_s22 = scalar_lea.hbm %s2593_s3, 32 }
  0x40   : > { %p1733_p9 = scmp.ne.s32.totalorder %s2593_s3, %s1732_s22  ;;  %p1739_p12 = scmp.lt.u32.totalorder %s1732_s22, %s2593_s3 }
  0x42   : > { %p1735_p10 = pnand %p1733_p9, %p2185_p7 }
  0x44   : > { %p1736_p11 = pneg %p1735_p10 }
  0x46   : > { %p1741_p13 = pnand %p1739_p12, %p1736_p11 }
  0x48   : > { %1744 = shalt.err (!%p1741_p13)
}
  0x49   : > { %s1745_s16 = scalar_lea.vmem %s2173_s19, 32  ;;  %p1753_p6 = scmp.lt.s32.totalorder %s2173_s19, %s2173_s19 }
  0x4a   : > { %p1746_p0 = scmp.ne.s32.totalorder %s2173_s19, %s1745_s16  ;;  %p1754_p8 = scmp.lt.s32.totalorder %s1745_s16, %s1745_s16 }
  0x4c   : > { %p1748_p2 = pnand %p1746_p0, %p2185_p7  ;;  %p1755_p9 = por %p1754_p8, %p1753_p6 }
  0x4e   : > { %p1749_p4 = pneg %p1748_p2 }
  0x50   : > { %p1756_p10 = pnand %p1755_p9, %p1749_p4 }
  0x52   : > { %1759 = shalt.err (!%p1756_p10)
}
  0x53   : > { %1497 = dma.hbm_to_vmem [thread:$0]  (!%p2169_p5), %s2593_s3, 32, %s2173_s19, [#allocation11]  }
  0x54   : > { %s2594_s5 = sld [smem:[#allocation33_spill]] }
  0x5a   : > { %s1760_s25 = scalar_lea.hbm %s2594_s5, 16 }
  0x5b   : > { %p1761_p11 = scmp.ne.s32.totalorder %s2594_s5, %s1760_s25  ;;  %p1767_p0 = scmp.lt.u32.totalorder %s1760_s25, %s2594_s5 }
  0x5d   : > { %p1763_p12 = pnand %p1761_p11, %p2185_p7 }
  0x5f   : > { %p1764_p13 = pneg %p1763_p12 }
  0x61   : > { %p1769_p2 = pnand %p1767_p0, %p1764_p13 }
  0x63   : > { %1772 = shalt.err (!%p1769_p2)
}
  0x64   : > { %s1773_s16 = scalar_lea.vmem %s308_s21, 16  ;;  %s1780_s19 = scalar_lea.vmem %s308_s21, 32 }
  0x65   : > { %p1774_p4 = scmp.ne.s32.totalorder %s308_s21, %s1773_s16  ;;  %p1781_p9 = scmp.lt.s32.totalorder %s308_s21, %s308_s21 }
  0x66   : > { %p1782_p10 = scmp.lt.s32.totalorder %s1780_s19, %s1773_s16 }
  0x67   : > { %p1776_p6 = pnand %p1774_p4, %p2185_p7 }
  0x68   : > { %p1783_p1 = por %p1782_p10, %p1781_p9 }
  0x69   : > { %p1777_p8 = pneg %p1776_p6 }
  0x6b   : > { %p1784_p3 = pnand %p1783_p1, %p1777_p8 }
  0x6d   : > { %1787 = shalt.err (!%p1784_p3)
}
  0x6e   : > { %1503 = dma.hbm_to_vmem [thread:$0]  (!%p2169_p5), %s2594_s5, 16, %s308_s21, [#allocation14]  }
  0x6f   : > { %s2057_s9 = smov [#allocation12]   ;;  %s2595_s4 = sld [smem:[#allocation32_spill]] }
  0x70   : > { %s293_s14 = sshll.u32 %s2057_s9, 4  ;;  %s294_s14 = int_to_ptr.vmem [resolvable:$true] %s293_s14 }
  0x75   : > { %s1788_s18 = scalar_lea.hbm %s2595_s4, 2048 }
  0x76   : > { %p1789_p11 = scmp.ne.s32.totalorder %s2595_s4, %s1788_s18  ;;  %p1795_p12 = scmp.lt.u32.totalorder %s1788_s18, %s2595_s4 }
  0x78   : > { %p1791_p1 = pnand %p1789_p11, %p2185_p7 }
  0x7a   : > { %p1792_p3 = pneg %p1791_p1 }
  0x7c   : > { %p1797_p13 = pnand %p1795_p12, %p1792_p3 }
  0x7e   : > { %1800 = shalt.err (!%p1797_p13)
}
  0x7f   : > { %s1801_s21 = scalar_lea.vmem %s294_s14, 2048  ;;  %p1809_p6 = scmp.lt.s32.totalorder %s294_s14, %s294_s14 }
  0x80   : > { %p1802_p0 = scmp.ne.s32.totalorder %s294_s14, %s1801_s21  ;;  %p1810_p8 = scmp.lt.s32.totalorder %s1801_s21, %s1801_s21 }
  0x82   : > { %p1804_p2 = pnand %p1802_p0, %p2185_p7  ;;  %p1811_p9 = por %p1810_p8, %p1809_p6 }
  0x84   : > { %p1805_p4 = pneg %p1804_p2 }
  0x86   : > { %p1812_p10 = pnand %p1811_p9, %p1805_p4 }
  0x88   : > { %1815 = shalt.err (!%p1812_p10)
}
  0x89   : > { %s2058_s8 = smov 64   ;;  %s2059_s30 = smov 4  }
  0x8a   : > { %1500 = dma.hbm_to_vmem [thread:$0]  (!%p2169_p5), %s2595_s4, 2048, %s294_s14, [#allocation11], %s2058_s8, %s2058_s8, %s2059_s30  }
  0x8b   : > { %s2060_s26 = smov [#allocation15]   ;;  %s2061_s20 = smov [#allocation16]  }
  0x8c   : > { %s318_s18 = sshll.u32 %s2060_s26, 4  ;;  %s329_s22 = sshll.u32 %s2061_s20, 4  ;;  %s319_s18 = int_to_ptr.vmem [resolvable:$true] %s318_s18  ;;  %s2269_s22 = int_to_ptr.vmem [resolvable:$true] %s329_s22 }
  0x8d   : > { %s2596_s6 = sld [smem:[#allocation34_spill]] }
  0x93   : > { %s1816_s21 = scalar_lea.hbm %s2596_s6, 16 }
  0x94   : > { %p1817_p11 = scmp.ne.s32.totalorder %s2596_s6, %s1816_s21  ;;  %p1823_p12 = scmp.lt.u32.totalorder %s1816_s21, %s2596_s6 }
  0x96   : > { %p1819_p1 = pnand %p1817_p11, %p2185_p7 }
  0x98   : > { %p1820_p3 = pneg %p1819_p1 }
  0x9a   : > { %p1825_p13 = pnand %p1823_p12, %p1820_p3 }
  0x9c   : > { %1828 = shalt.err (!%p1825_p13)
}
  0x9d   : > { %s1829_s8 = scalar_lea.vmem %s319_s18, 16  ;;  %s1836_s30 = scalar_lea.vmem %s319_s18, 32 }
  0x9e   : > { %p1830_p0 = scmp.ne.s32.totalorder %s319_s18, %s1829_s8  ;;  %p1837_p6 = scmp.lt.s32.totalorder %s319_s18, %s319_s18 }
  0x9f   : > { %p1838_p8 = scmp.lt.s32.totalorder %s1836_s30, %s1829_s8 }
  0xa0   : > { %p1832_p2 = pnand %p1830_p0, %p2185_p7 }
  0xa1   : > { %p1839_p9 = por %p1838_p8, %p1837_p6 }
  0xa2   : > { %p1833_p4 = pneg %p1832_p2 }
  0xa4   : > { %p1840_p10 = pnand %p1839_p9, %p1833_p4 }
  0xa6   : > { %1843 = shalt.err (!%p1840_p10)
}
  0xa7   : > { %1506 = dma.hbm_to_vmem [thread:$0]  (!%p2169_p5), %s2596_s6, 16, %s319_s18, [#allocation14]  }
  0xa8   : > { %s1844_s20 = scalar_lea.hbm %s2568_s7, 16 }
  0xa9   : > { %p1845_p11 = scmp.ne.s32.totalorder %s2568_s7, %s1844_s20  ;;  %p1851_p12 = scmp.lt.u32.totalorder %s1844_s20, %s2568_s7 }
  0xab   : > { %p1847_p1 = pnand %p1845_p11, %p2185_p7 }
  0xad   : > { %p1848_p3 = pneg %p1847_p1 }
  0xaf   : > { %p1853_p13 = pnand %p1851_p12, %p1848_p3 }
  0xb1   : > { %1856 = shalt.err (!%p1853_p13)
}
  0xb2   : > { %s1857_s18 = scalar_lea.vmem %s2269_s22, 16  ;;  %s1864_s14 = scalar_lea.vmem %s2269_s22, 32 }
  0xb3   : > { %p1858_p0 = scmp.ne.s32.totalorder %s2269_s22, %s1857_s18  ;;  %p1865_p6 = scmp.lt.s32.totalorder %s2269_s22, %s2269_s22 }
  0xb4   : > { %p1866_p8 = scmp.lt.s32.totalorder %s1864_s14, %s1857_s18 }
  0xb5   : > { %p1860_p2 = pnand %p1858_p0, %p2185_p7 }
  0xb6   : > { %p1867_p9 = por %p1866_p8, %p1865_p6 }
  0xb7   : > { %p1861_p4 = pneg %p1860_p2 }
  0xb9   : > { %p1868_p10 = pnand %p1867_p9, %p1861_p4 }
  0xbb   : > { %1871 = shalt.err (!%p1868_p10)
}
  0xbc   : > { %1509 = dma.hbm_to_vmem [thread:$0]  (!%p2169_p5), %s2568_s7, 16, %s2269_s22, [#allocation17]  }
  0xbd   : > { %s1331_s15 = sadd.s32 4294967294, %s2050_s12   ;;  %s39_s17 = sadd.s32 1, %s2042_s10 }
  0xbe   : > { %p40_p7 = scmp.ge.s32.totalorder %s39_s17, 2  ;;  %s42_s23 = sadd.s32 1, %s2046_s11 }
  0xbf   : > { %s51_s24 = sadd.s32 1, %s2030_s29  ;;  %p58_p11 = scmp.ne.s32.totalorder %s2030_s29, %s2026_s28 }
  0xc0   : > { %s2629_s17 = smov (%p40_p7, %s39_s17), 0  ;;  %s2631_s23 = smov (!%p40_p7, %s42_s23), %s2046_s11 }
  0xc1   : > { %s47_s25 = ssub.s32 %s2042_s10, %s2629_s17  ;;  %p59_p1 = scmp.eq.s32.totalorder %s2050_s12, 0 }
  0xc2   : > { %p44_p3 = scmp.ge.s32.totalorder %s2631_s23, 2  ;;  %p64_p5 = scmp.ne.s32.totalorder %s2026_s28, %s2022_s27 }
  0xc3   : > { %p2327_p12 = por %p59_p1, %p58_p11  ;;  %p244_p13 = scmp.eq.s32.totalorder %s2154_s13, 3 }
  0xc4   : > { %s2633_s23 = smov (%p44_p3, %s2631_s23), 0  ;;  %p2598_p0 = scmp.eq.s32.totalorder %s2154_s13, 0 }
  0xc5   : > { %p2340_p4 = por %p244_p13, %p58_p11  ;;  %s46_s16 = ssub.s32 %s2046_s11, %s2633_s23 }
  0xc6   : > { %p2336_p2 = por %p2598_p0, %p64_p5  ;;  %p250_p6 = scmp.eq.s32.totalorder %s1331_s15, 3 }
  0xc7   : > { %s2600_s20 = scalar_select %p2340_p4, 1, 0 }
  0xc8   : > { %s48_s19 = sor.u32 %s47_s25, %s46_s16  ;;  %p1527_p8 = scmp.lt.s32.totalorder %s2050_s12, 4 }
  0xc9   : > { %p49_p9 = scmp.eq.s32.totalorder %s48_s19, 0  ;;  %p2347_p10 = por %p250_p6, %p64_p5 }
  0xca   : > { %s340_s9 = sand.u32 1, %s2030_s29   ;;  %s1341_s18 = sshll.u32 %s2042_s10, 1 }
  0xcb   : > { %s2601_s21 = scalar_select %p2347_p10, 1, 0 }
  0xcc   : > { %s2354_s14 = scalar_select %p49_p9, %s2030_s29, %s51_s24  }
  0xcd   : > { %s1340_s8 = sshll.u32 %s340_s9, 4  ;;  %s1342_s30 = sshll.u32 %s2046_s11, 2 }
  0xce   : > { %s350_s2 = sadd.s32 %s1342_s30, %s1341_s18  ;;  %s344_s3 = scalar_lea.vmem [#allocation4], %s1340_s8 }
  0xcf   : > { %s353_s4 = sshll.u32 %s344_s3, 4  ;;  %s1343_s5 = sshll.u32 %s350_s2, 7  ;;  %s2357_s4 = int_to_ptr.vmem [resolvable:$true] %s353_s4 }
  0xd0   : > { %s2602_s0 = sld [smem:[#allocation29_spill]]  ;;  %p2368_p7 = pnand %p1527_p8, %p2327_p12 }
  0xd1   : > { %s2375_s2 = scalar_lea.hbm %s2562_s1, %s1343_s5  ;;  %s367_s18 = scalar_lea.vmem [#allocation7], %s1340_s8 }
  0xd2   : > { %s2377_s30 = sshll.u32 %s367_s18, 4  ;;  %s2379_s22 = scalar_lea.sflag [#allocation5], %s340_s9  ;;  %s2411_s30 = int_to_ptr.vmem [resolvable:$true] %s2377_s30 }
  0xd3   : > { %p1874_p1 = pneg %p2368_p7 }
  0xd6   : > { %s2362_s16 = scalar_lea.hbm %s2602_s0, %s1343_s5  ;;  %s1877_s19 = scalar_lea.hbm %s2602_s0, 1024 }
  0xd7   : > { %s1872_s15 = scalar_lea.hbm %s2362_s16, 256  ;;  %p1878_p12 = scmp.lt.u32.totalorder %s2362_s16, %s2602_s0 }
  0xd8   : > { %p1873_p11 = scmp.ne.s32.totalorder %s2362_s16, %s1872_s15  ;;  %p1879_p13 = scmp.lt.u32.totalorder %s1877_s19, %s1872_s15 }
  0xd9   : > { %p1881_p6 = scmp.lt.u32.totalorder %s1872_s15, %s2362_s16 }
  0xda   : > { %p1875_p3 = pnand %p1874_p1, %p1873_p11  ;;  %p1880_p0 = por %p1879_p13, %p1878_p12 }
  0xdc   : > { %p1876_p5 = pneg %p1875_p3  ;;  %p1882_p8 = por %p1881_p6, %p1880_p0 }
  0xde   : > { %p1883_p9 = pnand %p1882_p8, %p1876_p5 }
  0xe0   : > { %1886 = shalt.err (!%p1883_p9)
}
  0xe1   : > { %s1887_s9 = scalar_lea.vmem %s2357_s4, 256  ;;  %s2062_s6 = smov [#allocation4]  }
  0xe2   : > { %p1888_p11 = scmp.ne.s32.totalorder %s2357_s4, %s1887_s9  ;;  %s1892_s8 = sshll.u32 %s2062_s6, 4  ;;  %s1893_s8 = int_to_ptr.vmem [resolvable:$false] %s1892_s8 }
  0xe3   : > { %s1894_s18 = scalar_lea.vmem %s1893_s8, 512  ;;  %p1895_p4 = scmp.lt.s32.totalorder %s2357_s4, %s1893_s8 }
  0xe4   : > { %p1890_p3 = pnand %p1888_p11, %p1874_p1  ;;  %p1896_p12 = scmp.lt.s32.totalorder %s1894_s18, %s1887_s9 }
  0xe6   : > { %p1891_p10 = pneg %p1890_p3  ;;  %p1897_p13 = por %p1896_p12, %p1895_p4 }
  0xe8   : > { %p1898_p0 = pnand %p1897_p13, %p1891_p10 }
  0xea   : > { %1901 = shalt.err (!%p1898_p0)
}
  0xeb   : > { %s2604_s15 = smov 8   ;;  %s2605_s25 = smov 128  }
  0xec   : > { %1513 = dma.hbm_to_vmem [thread:$0]  (!%p2368_p7), %s2362_s16, 256, %s2357_s4, %s2379_s22, %s2605_s25, %s2605_s25, %s2604_s15  }
  0xed   : > { %s363_s19 = sand.u32 1, %s2050_s12   ;;  %s1902_s5 = scalar_lea.hbm %s2375_s2, 256 }
  0xee   : > { %s2414_s3 = scalar_lea.sflag [#allocation8], %s363_s19  ;;  %p1903_p4 = scmp.ne.s32.totalorder %s2375_s2, %s1902_s5 }
  0xef   : > { %s1907_s8 = scalar_lea.hbm %s2562_s1, 1024  ;;  %p1908_p6 = scmp.lt.u32.totalorder %s2375_s2, %s2562_s1 }
  0xf0   : > { %p1905_p10 = pnand %p1903_p4, %p1874_p1  ;;  %p1909_p8 = scmp.lt.u32.totalorder %s1907_s8, %s1902_s5 }
  0xf1   : > { %p1911_p11 = scmp.lt.u32.totalorder %s1902_s5, %s2375_s2 }
  0xf2   : > { %p1906_p5 = pneg %p1905_p10  ;;  %p1910_p9 = por %p1909_p8, %p1908_p6 }
  0xf4   : > { %p1912_p3 = por %p1911_p11, %p1910_p9 }
  0xf6   : > { %p1913_p12 = pnand %p1912_p3, %p1906_p5 }
  0xf8   : > { %1916 = shalt.err (!%p1913_p12)
}
  0xf9   : > { %s1917_s4 = scalar_lea.vmem %s2411_s30, 256  ;;  %s2063_s16 = smov [#allocation7]  }
  0xfa   : > { %p1918_p13 = scmp.ne.s32.totalorder %s2411_s30, %s1917_s4  ;;  %s1922_s22 = sshll.u32 %s2063_s16, 4  ;;  %s1923_s22 = int_to_ptr.vmem [resolvable:$false] %s1922_s22 }
  0xfb   : > { %s1924_s0 = scalar_lea.vmem %s1923_s22, 512  ;;  %p1925_p10 = scmp.lt.s32.totalorder %s2411_s30, %s1923_s22 }
  0xfc   : > { %p1920_p0 = pnand %p1918_p13, %p1874_p1  ;;  %p1926_p6 = scmp.lt.s32.totalorder %s1924_s0, %s1917_s4 }
  0xfe   : > { %p1921_p4 = pneg %p1920_p0  ;;  %p1927_p8 = por %p1926_p6, %p1925_p10 }
 0x100   : > { %p1928_p9 = pnand %p1927_p8, %p1921_p4 }
 0x102   : > { %1931 = shalt.err (!%p1928_p9)
}
 0x103   : > { %1516 = dma.hbm_to_vmem [thread:$0]  (!%p2368_p7), %s2375_s2, 256, %s2411_s30, %s2414_s3, %s2605_s25, %s2605_s25, %s2604_s15  }
 0x104   : > { %s2606_s19 = sld [smem:[#allocation28_spill]] }
 0x10a   : > { %p2607_p1 = scmp.ne.s32.totalorder %s2606_s19, 0 }
 0x10b   : > { %s2446_s5 = sand.u32 (!%p2607_p1), 1, %s2026_s28  }
 0x10c   : > { %388 = sbr.rel (%p2607_p1) target bundleno = 986 (0x3da), region = 52  ;;  %s2449_s9 = sshll.u32 (!%p2607_p1), %s2446_s5, 4 }
 0x10d   : > { %s391_s24 = scalar_lea.sflag (!%p2607_p1), [#allocation5], %s2446_s5  ;;  %s394_s6 = scalar_lea.vmem (!%p2607_p1), [#allocation4], %s2449_s9 }
 0x113   : > { %1993 = dma.done.wait (%p2336_p2), %s391_s24, 256  }
 0x114   : > { %1995 = vsyncadd (%p2336_p2), %s391_s24, 4294967040  ;;  %s399_s2 = sand.u32 1, %s2154_s13   ;;  %s403_s15 = scalar_lea.vmem [#allocation7], %s2449_s9 }
 0x115   : > { %s400_s30 = scalar_lea.sflag [#allocation8], %s399_s2 }
 0x116   : > { %1997 = dma.done.wait (%p2336_p2), %s400_s30, 256  }
 0x117   : > { %1999 = vsyncadd (%p2336_p2), %s400_s30, 4294967040  ;;  %p2608_p7 = scmp.eq.s32.totalorder %s2154_s13, 0 }
 0x119   : > { %2001 = dma.done.wait (%p2608_p7), [#allocation8], 6144   ;;  %p2609_p5 = pmov %p2608_p7 }
 0x11b   : > { %2003 = vsyncadd (%p2609_p5), [#allocation8], 4294961152  ;;  %p2610_p11 = pmov %p2609_p5 }
 0x11c   : > { %p2611_p3 = pmov %p2609_p5 }
 0x11d   : > { %2005 = dma.done.wait (%p2610_p11), [#allocation11], 2080  }
 0x11e   : > { %2007 = vsyncadd (%p2611_p3), [#allocation11], 4294965216  ;;  %p2612_p12 = pmov %p2611_p3 }
 0x11f   : > { %p2613_p13 = pmov %p2611_p3 }
 0x120   : > { %2009 = dma.done.wait (%p2612_p12), [#allocation14], 32  }
 0x121   : > { %2011 = vsyncadd (%p2613_p13), [#allocation14], 4294967264  ;;  %p2614_p2 = pmov %p2611_p3 }
 0x123   : > { %2013 = dma.done.wait (%p2614_p2), [#allocation17], 16   ;;  %p2615_p0 = pmov %p2614_p2 }
 0x124   : > { %v2064_v0 = vmov 0   ;;  %v1612_v1 = vld [vmem:[#allocation9 + $0x4] ss:$8 sps:$4 sm:$0xff]   ;;  %v1614_v2 = vld [vmem:[#allocation9] ss:$8 sps:$4 sm:$0xff]   ;;  %v1688_v60 = vld [vmem:[#allocation12 + $0x50] sm:$0xff]  }
 0x125   : > { %2015 = vsyncadd (%p2615_p0), [#allocation17], 4294967280  ;;  %898 = vmatprep.mubr.bf16.mxu1 %v2064_v0  ;;  %823 = vmatprep.subr.bf16.mxu0 %v1612_v1  ;;  %v1615_v3 = vld [vmem:[#allocation9 + $0x14] ss:$8 sps:$4 sm:$0xff]   ;;  %v1617_v4 = vld [vmem:[#allocation9 + $0x10] ss:$8 sps:$4 sm:$0xff]  }
 0x126   : > { %824 = vmatpush1.bf16.msra.mxu0 %v1614_v2  ;;  %v1618_v5 = vld [vmem:[#allocation9 + $0x24] ss:$8 sps:$4 sm:$0xff]   ;;  %v1620_v6 = vld [vmem:[#allocation9 + $0x20] ss:$8 sps:$4 sm:$0xff]   ;;  %v1621_v7 = vld [vmem:[#allocation9 + $0x34] ss:$8 sps:$4 sm:$0xff]  }
 0x127   : > { %825 = vmatprep.subr.bf16.mxu0 %v1615_v3  ;;  %v1623_v8 = vld [vmem:[#allocation9 + $0x30] ss:$8 sps:$4 sm:$0xff]   ;;  %v1636_v9 = vld [vmem:[#allocation9 + $0x104] ss:$8 sps:$4 sm:$0xff]   ;;  %v1640_v11 = vld [vmem:[#allocation9 + $0x100] ss:$8 sps:$4 sm:$0xff]  }
 0x128   : > { %v1624_v10 = vld [vmem:[#allocation9 + $0x44] ss:$8 sps:$4 sm:$0xff]   ;;  %866 = vmatprep.subr.bf16.mxu1 %v1636_v9  ;;  %v1642_v12 = vld [vmem:[#allocation9 + $0x114] ss:$8 sps:$4 sm:$0xff]   ;;  %v1626_v13 = vld [vmem:[#allocation9 + $0x40] ss:$8 sps:$4 sm:$0xff]  }
 0x129   : > { %867 = vmatpush1.bf16.msra.mxu1 %v1640_v11  ;;  %v1627_v14 = vld [vmem:[#allocation9 + $0x54] ss:$8 sps:$4 sm:$0xff]   ;;  %v1646_v15 = vld [vmem:[#allocation9 + $0x110] ss:$8 sps:$4 sm:$0xff]   ;;  %v1648_v16 = vld [vmem:[#allocation9 + $0x124] ss:$8 sps:$4 sm:$0xff]  }
 0x12a   : > { %826 = vmatpush1.bf16.msra.mxu0 %v1617_v4  ;;  %868 = vmatprep.subr.bf16.mxu1 %v1642_v12  ;;  %v1629_v17 = vld [vmem:[#allocation9 + $0x50] ss:$8 sps:$4 sm:$0xff]   ;;  %v1652_v18 = vld [vmem:[#allocation9 + $0x120] ss:$8 sps:$4 sm:$0xff]   ;;  %v1654_v19 = vld [vmem:[#allocation9 + $0x134] ss:$8 sps:$4 sm:$0xff]  }
 0x12b   : > { %827 = vmatprep.subr.bf16.mxu0 %v1618_v5  ;;  %v1630_v20 = vld [vmem:[#allocation9 + $0x64] ss:$8 sps:$4 sm:$0xff]   ;;  %v1658_v21 = vld [vmem:[#allocation9 + $0x130] ss:$8 sps:$4 sm:$0xff]   ;;  %v1632_v22 = vld [vmem:[#allocation9 + $0x60] ss:$8 sps:$4 sm:$0xff]  }
 0x12c   : > { %v1660_v23 = vld [vmem:[#allocation9 + $0x144] ss:$8 sps:$4 sm:$0xff]   ;;  %v1633_v24 = vld [vmem:[#allocation9 + $0x74] ss:$8 sps:$4 sm:$0xff]   ;;  %v1635_v25 = vld [vmem:[#allocation9 + $0x70] ss:$8 sps:$4 sm:$0xff]  }
 0x12d   : > { %869 = vmatpush1.bf16.msra.mxu1 %v1646_v15  ;;  %v1664_v26 = vld [vmem:[#allocation9 + $0x140] ss:$8 sps:$4 sm:$0xff]   ;;  %v1666_v27 = vld [vmem:[#allocation9 + $0x154] ss:$8 sps:$4 sm:$0xff]   ;;  %v1638_v28 = vld [vmem:[#allocation9 + $0x84] ss:$8 sps:$4 sm:$0xff]  }
 0x12e   : > { %828 = vmatpush1.bf16.msra.mxu0 %v1620_v6  ;;  %870 = vmatprep.subr.bf16.mxu1 %v1648_v16  ;;  %v1670_v29 = vld [vmem:[#allocation9 + $0x150] ss:$8 sps:$4 sm:$0xff]   ;;  %v1641_v30 = vld [vmem:[#allocation9 + $0x80] ss:$8 sps:$4 sm:$0xff]   ;;  %v1672_v31 = vld [vmem:[#allocation9 + $0x164] ss:$8 sps:$4 sm:$0xff]  }
 0x12f   : > { %829 = vmatprep.subr.bf16.mxu0 %v1621_v7  ;;  %v1644_v32 = vld [vmem:[#allocation9 + $0x94] ss:$8 sps:$4 sm:$0xff]   ;;  %vm505_vm0 = vsmask.f32 7424  ;;  %v1676_v37 = vld [vmem:[#allocation9 + $0x160] ss:$8 sps:$4 sm:$0xff]  }
 0x130   : > { %v2481_v33 = vld [vmem:[%s394_s6] sm:$0xff]  ;;  %v2485_v34 = vld [vmem:[%s394_s6 + $0x8] sm:$0xff]  ;;  %vm482_vm1 = vsmask.f32 4352  ;;  %s2616_s13 = sld [smem:[#allocation26_spill]]  ;;  %s2617_s26 = sld [smem:[#allocation27_spill]] }
 0x131   : > { %871 = vmatpush1.bf16.msra.mxu1 %v1652_v18  ;;  %v502_v35 = vpack.c.bf16 %v2485_v34, %v2481_v33  ;;  %v474_v36 = vld [vmem:[%s403_s15 + $0x8] sm:$0xff]  ;;  %v468_v54 = vld [vmem:[%s403_s15] sm:$0xff]  ;;  %v481_v63 = vpack.c.bf16 %v2485_v34, %v2485_v34  ;;  %s464_s4 = scalar_lea.vmem [#allocation18], %s2449_s9  ;;  %s2618_s19 = sld [smem:[#allocation35_spill]] }
 0x132   : > { %830 = vmatpush1.bf16.msra.mxu0 %v1623_v8  ;;  %872 = vmatprep.subr.bf16.mxu1 %v1654_v19  ;;  %v504_v38 = vpack.c.bf16 %v474_v36, %v474_v36  ;;  %v1647_v39 = vld [vmem:[#allocation9 + $0x90] ss:$8 sps:$4 sm:$0xff]   ;;  %v1650_v40 = vld [vmem:[#allocation9 + $0xa4] ss:$8 sps:$4 sm:$0xff]   ;;  %v1678_v41 = vld [vmem:[#allocation9 + $0x174] ss:$8 sps:$4 sm:$0xff]   ;;  %v480_v62 = vpack.c.bf16 %v2481_v33, %v468_v54 }
 0x133   : > { %831 = vmatprep.subr.bf16.mxu0 %v1624_v10  ;;  %v509_v42 = vshll.u32 %v502_v35, 16  ;;  %855 = vmatprep.mubr.bf16.mxu0 %v502_v35  ;;  %v507_v43 = vshrl.u32 %v502_v35, 16  ;;  %v1653_v45 = vld [vmem:[#allocation9 + $0xa0] ss:$8 sps:$4 sm:$0xff]   ;;  %v1682_v46 = vld [vmem:[#allocation9 + $0x170] ss:$8 sps:$4 sm:$0xff]  }
 0x134   : > { %v514_v44 = vshll.u32 %v504_v38, 16  ;;  %v1684_v49 = vld [vmem:[#allocation12 + $0x40] sm:$0xff]   ;;  %v1656_v50 = vld [vmem:[#allocation9 + $0xb4] ss:$8 sps:$4 sm:$0xff]   ;;  %v1659_v52 = vld [vmem:[#allocation9 + $0xb0] ss:$8 sps:$4 sm:$0xff]  }
 0x135   : > { %873 = vmatpush1.bf16.msra.mxu1 %v1658_v21  ;;  %v511_v47 = vrot.slane %v509_v42, 1  ;;  %v1662_v53 = vld [vmem:[#allocation9 + $0xc4] ss:$8 sps:$4 sm:$0xff]   ;;  %v1665_v59 = vld [vmem:[#allocation9 + $0xc0] ss:$8 sps:$4 sm:$0xff]   ;;  %v1689_v1 = vld [vmem:[#allocation12 + $0x10] sm:$0xff]  }
 0x136   : > { %832 = vmatpush1.bf16.msra.mxu0 %v1626_v13  ;;  %874 = vmatprep.subr.bf16.mxu1 %v1660_v23  ;;  %v516_v48 = vrot.slane %v514_v44, 1  ;;  %v1685_v56 = vld [vmem:[#allocation12] sm:$0xff]   ;;  %v1686_v57 = vld [vmem:[#allocation12 + $0x48] sm:$0xff]   ;;  %v1668_v61 = vld [vmem:[#allocation9 + $0xd4] ss:$8 sps:$4 sm:$0xff]   ;;  %v484_v2 = vshrl.u32 %v480_v62, 16 }
 0x137   : > { %833 = vmatprep.subr.bf16.mxu0 %v1627_v14  ;;  %v512_v51 = vor.u32 %v511_v47, %v507_v43  ;;  %v1687_v58 = vld [vmem:[#allocation12 + $0x8] sm:$0xff]   ;;  %v487_v3 = vshll.u32 %v480_v62, 16  ;;  %v492_v4 = vshrl.u32 %v481_v63, 16  ;;  %v495_v5 = vshll.u32 %v481_v63, 16  ;;  %v1690_v6 = vld [vmem:[#allocation12 + $0x58] sm:$0xff]   ;;  %v1692_v14 = vld [vmem:[#allocation12 + $0x60] sm:$0xff]  }
 0x138   : > { %v1671_v0 = vld [vmem:[#allocation9 + $0xd0] ss:$8 sps:$4 sm:$0xff]   ;;  %v1674_v7 = vld [vmem:[#allocation9 + $0xe4] ss:$8 sps:$4 sm:$0xff]   ;;  %v1677_v8 = vld [vmem:[#allocation9 + $0xe0] ss:$8 sps:$4 sm:$0xff]  }
 0x139   : > { %875 = vmatpush1.bf16.msra.mxu1 %v1664_v26  ;;  %v517_v55 = vsel %vm505_vm0, %v512_v51, %v516_v48  ;;  %v1691_v9 = vld [vmem:[#allocation12 + $0x18] sm:$0xff]   ;;  %v486_v10 = vrot.slane %v484_v2, 3  ;;  %v489_v11 = vrot.slane %v487_v3, 4  ;;  %v494_v12 = vrot.slane %v492_v4, 3  ;;  %v1693_v16 = vld [vmem:[#allocation12 + $0x20] sm:$0xff]   ;;  %v1694_v21 = vld [vmem:[#allocation12 + $0x68] sm:$0xff]  }
 0x13a   : > { %834 = vmatpush1.bf16.msra.mxu0 %v1629_v17  ;;  %876 = vmatprep.subr.bf16.mxu1 %v1666_v27  ;;  %v497_v13 = vrot.slane %v495_v5, 4  ;;  %v1680_v15 = vld [vmem:[#allocation9 + $0xf4] ss:$8 sps:$4 sm:$0xff]   ;;  %v1683_v17 = vld [vmem:[#allocation9 + $0xf0] ss:$8 sps:$4 sm:$0xff]   ;;  %s1426_s25 = sshll.u32 %s2616_s13, 1 }
 0x13b   : > { %835 = vmatprep.subr.bf16.mxu0 %v1630_v20  ;;  %v490_v18 = vor.u32 %v489_v11, %v486_v10  ;;  %v1696_v23 = vld [vmem:[#allocation12 + $0x70] sm:$0xff]   ;;  %v1699_v26 = vld [vmem:[#allocation12 + $0x38] sm:$0xff]   ;;  %s1427_s3 = sshll.u32 %s2617_s26, 2  ;;  %s1157_s16 = sshll.u32 %s464_s4, 4  ;;  %s2507_s16 = int_to_ptr.vmem [resolvable:$true] %s1157_s16 }
 0x13c   : > { %v498_v19 = vor.u32 %v497_v13, %v494_v12  ;;  %v571_v36 = vld [vmem:[#allocation10] sm:$0x3]  ;;  %s1154_s8 = sadd.s32 %s1427_s3, %s1426_s25  ;;  %s1142_s6 = scalar_lea.sflag [#allocation6], %s2446_s5 }
 0x13d   : > { %877 = vmatpush1.bf16.msra.mxu1 %v1670_v29  ;;  %s1428_s18 = sshll.u32 %s1154_s8, 7  ;;  %s1932_s2 = scalar_lea.vmem %s2507_s16, 256 }
 0x13e   : > { %836 = vmatpush1.bf16.msra.mxu0 %v1632_v22  ;;  %878 = vmatprep.subr.bf16.mxu1 %v1672_v31  ;;  %v499_v20 = vsel %vm482_vm1, %v490_v18, %v498_v19  ;;  %v1695_v22 = vld [vmem:[#allocation12 + $0x28] sm:$0xff]   ;;  %v573_v31 = vlaneseq  ;;  %s2505_s24 = scalar_lea.hbm %s2618_s19, %s1428_s18  ;;  %p1933_p4 = scmp.ne.s32.totalorder %s2507_s16, %s1932_s2 }
 0x13f   : > { %837 = vmatprep.subr.bf16.mxu0 %v1633_v24  ;;  %v1697_v24 = vld [vmem:[#allocation12 + $0x30] sm:$0xff]   ;;  %p2619_p10 = scmp.ne.s32.totalorder %s2600_s20, 0  ;;  %s2065_s9 = smov [#allocation18]  }
 0x140   : > { %s1936_s30 = sshll.u32 %s2065_s9, 4  ;;  %s1937_s30 = int_to_ptr.vmem [resolvable:$false] %s1936_s30 }
 0x141   : > { %879 = vmatpush1.bf16.msra.mxu1 %v1676_v37  ;;  %p1934_p6 = pnand %p1933_p4, %p2619_p10  ;;  %s1938_s15 = scalar_lea.vmem %s1937_s30, 512 }
 0x142   : > { %838 = vmatpush1.bf16.msra.mxu0 %v1635_v25  ;;  %880 = vmatprep.subr.bf16.mxu1 %v1678_v41  ;;  %v1698_v25 = vld [vmem:[#allocation12 + $0x78] sm:$0xff]   ;;  %p1939_p9 = scmp.lt.s32.totalorder %s2507_s16, %s1937_s30  ;;  %p1940_p1 = scmp.lt.s32.totalorder %s1938_s15, %s1932_s2 }
 0x143   : > { %839 = vmatprep.subr.bf16.mxu0 %v1638_v28  ;;  %p1935_p8 = pneg %p1934_p6 }
 0x144   : > { %p1941_p7 = por %p1940_p1, %p1939_p9 }
 0x145   : > { %881 = vmatpush1.bf16.msra.mxu1 %v1682_v46 }
 0x146   : > { %840 = vmatpush1.bf16.msra.mxu0 %v1641_v30  ;;  %1431 = vmatprep.subr.bf16.mxu1 %v1684_v49  ;;  %p1942_p5 = pnand %p1941_p7, %p1935_p8 }
 0x147   : > { %841 = vmatprep.subr.bf16.mxu0 %v1644_v32  ;;  %v574_v32 = vshrl.u32 %v573_v31, 7 }
 0x148   : > { %899 = vmatmul.mubr.bf16.vlgmr.msra.gmra.mrb[0].mxu1 %v517_v55 }
 0x149   : > { %1432 = vmatpush3.bf16.msra.mxu1 %v1685_v56  ;;  %v575_v35 = vsub.s32 0, %v574_v32  ;;  %v579_v37 = vsub.s32 1, %v574_v32 }
 0x14a   : > { %842 = vmatpush1.bf16.msra.mxu0 %v1647_v39  ;;  %1433 = vmatprep.subr.bf16.mxu1 %v1686_v57 }
 0x14b   : > { %843 = vmatprep.subr.bf16.mxu0 %v1650_v40  ;;  %v576_v38 = vrot.slane %v571_v36, %v575_v35  ;;  %v580_v39 = vrot.slane %v571_v36, %v579_v37 }
 0x14d   : > { %1434 = vmatpush3.bf16.msra.mxu1 %v1687_v58 }
 0x14e   : > { %844 = vmatpush1.bf16.msra.mxu0 %v1653_v45  ;;  %1435 = vmatprep.subr.bf16.mxu1 %v1688_v60 }
 0x14f   : > { %845 = vmatprep.subr.bf16.mxu0 %v1656_v50 }
 0x151   : > { %1436 = vmatpush3.bf16.msra.mxu1 %v1689_v1 }
 0x152   : > { %846 = vmatpush1.bf16.msra.mxu0 %v1659_v52  ;;  %1437 = vmatprep.subr.bf16.mxu1 %v1690_v6 }
 0x153   : > { %847 = vmatprep.subr.bf16.mxu0 %v1662_v53 }
 0x155   : > { %1438 = vmatpush3.bf16.msra.mxu1 %v1691_v9 }
 0x156   : > { %848 = vmatpush1.bf16.msra.mxu0 %v1665_v59  ;;  %1439 = vmatprep.subr.bf16.mxu1 %v1692_v14  ;;  %v1406_v59 = vld [vmem:[#allocation13] ss:$0 sm:$0xff] }
 0x157   : > { %849 = vmatprep.subr.bf16.mxu0 %v1668_v61 }
 0x159   : > { %1440 = vmatpush3.bf16.msra.mxu1 %v1693_v16 }
 0x15a   : > { %850 = vmatpush1.bf16.msra.mxu0 %v1671_v0  ;;  %1441 = vmatprep.subr.bf16.mxu1 %v1694_v21  ;;  %v1423_v21 = vld [vmem:[#allocation15] ss:$0 sm:$0xff] }
 0x15b   : > { %851 = vmatprep.subr.bf16.mxu0 %v1674_v7 }
 0x15d   : > { %1442 = vmatpush3.bf16.msra.mxu1 %v1695_v22 }
 0x15e   : > { %852 = vmatpush1.bf16.msra.mxu0 %v1677_v8  ;;  %1443 = vmatprep.subr.bf16.mxu1 %v1696_v23  ;;  %v1424_v23 = vld [vmem:[#allocation16] ss:$0 sm:$0xff] }
 0x15f   : > { %853 = vmatprep.subr.bf16.mxu0 %v1680_v15 }
 0x161   : > { %1444 = vmatpush3.bf16.msra.mxu1 %v1697_v24 }
 0x162   : > { %854 = vmatpush1.bf16.msra.mxu0 %v1683_v17  ;;  %1445 = vmatprep.subr.bf16.mxu1 %v1698_v25 }
 0x165   : > { %856 = vmatmul.mubr.bf16.vlgmr.msra.gmra.mrb[0].mxu0 %v499_v20  ;;  %1446 = vmatpush3.bf16.msra.mxu1 %v1699_v26 }
 0x21b   : > { %v900_v27 = vpop.f32.mrb[0].mxu1 }
 0x21c   : > { %v902_v28 = vpop.f32.mrb[1].mxu1 }
 0x21d   : > { %v904_v29 = vpop.f32.mrb[2].mxu1 }
 0x21e   : > { %v906_v30 = vpop.f32.mrb[3].mxu1 }
 0x238   : > { %v857_v40 = vpop.f32.mrb[0].mxu0 }
 0x239   : > { %v858_v41 = vadd.f32 %v857_v40, %v576_v38  ;;  %v859_v42 = vpop.f32.mrb[1].mxu0 }
 0x23a   : > { %v860_v43 = vadd.f32 %v859_v42, %v580_v39  ;;  %v861_v44 = vpop.f32.mrb[2].mxu0 }
 0x23b   : > { %v901_v45 = vadd.f32 %v900_v27, %v858_v41  ;;  %v862_v46 = vadd.f32 %v861_v44, %v576_v38  ;;  %v863_v47 = vpop.f32.mrb[3].mxu0 }
 0x23c   : > { %v903_v48 = vadd.f32 %v902_v28, %v860_v43  ;;  %v864_v49 = vadd.f32 %v863_v47, %v580_v39 }
 0x23d   : > { %v905_v50 = vadd.f32 %v904_v29, %v862_v46  ;;  %v909_v52 = vmax.f32 %v901_v45, 0.0 }
 0x23e   : > { %v907_v51 = vadd.f32 %v906_v30, %v864_v49  ;;  %v910_v54 = vmax.f32 %v903_v48, 0.0 }
 0x23f   : > { %v911_v53 = vmax.f32 %v905_v50, 0.0 }
 0x240   : > { %v912_v55 = vmax.f32 %v907_v51, 0.0 }
 0x241   : > { %v913_v56 = vpack.c.bf16 %v911_v53, %v909_v52 }
 0x242   : > { %v914_v57 = vpack.c.bf16 %v912_v55, %v910_v54 }
 0x244   : > { %1082 = vmatprep.mubr.bf16.mxu1 %v914_v57 }
 0x245   : > { %1083 = vmatmul.mubr.bf16.vlgmr.msra.gmra.mrb[4].mxu1 %v913_v56 }
 0x318   : > { %v1447_v58 = vpop.f32.mrb[4].mxu1 }
 0x319   : > { %v1448_v60 = vpop.f32.mrb[5].mxu1 }
 0x31a   : > { %v1449_v61 = vadd.f32 %v1448_v60, %v1447_v58  ;;  %v1450_v62 = vpop.f32.mrb[6].mxu1 }
 0x31b   : > { %v1451_v63 = vpop.f32.mrb[7].mxu1 }
 0x31c   : > { %v1085_v0 = vadd.f32 %v1449_v61, %v1406_v59  ;;  %v1452_v1 = vadd.f32 %v1451_v63, %v1450_v62 }
 0x31e   : > { %v1088_v2 = vadd.f32 %v1452_v1, %v1406_v59  ;;  %v1093_v3 = vadd.f32 %v1085_v0, %v2481_v33 }
 0x320   : > { %1095 = vadd.xlane.f32.xlu0 %v1093_v3  ;;  %v1099_v4 = vmul.f32 %v1093_v3, %v1093_v3  ;;  %v1094_v5 = vadd.f32 %v1088_v2, %v2485_v34 }
 0x322   : > { %1101 = vadd.xlane.f32.xlu1 %v1099_v4  ;;  %v1100_v6 = vmul.f32 %v1094_v5, %v1094_v5 }
 0x324   : > { %1097 = vadd.xlane.f32.xlu0 %v1094_v5 }
 0x326   : > { %1103 = vadd.xlane.f32.xlu1 %v1100_v6 }
 0x3ad   : > { %v1096_v7 = vpop.xlane.xlu0 %1095 }
 0x3ae   : > { %v1105_v8 = vmul.f32 0.0078125, %v1096_v7 }
 0x3af   : > { %v1102_v9 = vpop.xlane.xlu1 %1101 }
 0x3b0   : > { %v1109_v10 = vmul.f32 %v1105_v8, %v1105_v8  ;;  %v1107_v11 = vmul.f32 0.0078125, %v1102_v9  ;;  %v1113_v19 = vsub.f32 %v1093_v3, %v1105_v8 }
 0x3b1   : > { %v1098_v12 = vpop.xlane.xlu0 %1097 }
 0x3b2   : > { %v1111_v13 = vsub.f32 %v1107_v11, %v1109_v10  ;;  %v1106_v14 = vmul.f32 0.0078125, %v1098_v12 }
 0x3b3   : > { %v1104_v15 = vpop.xlane.xlu1 %1103 }
 0x3b4   : > { %v1115_v33 = vadd.f32 1e-05, %v1111_v13  ;;  %v1110_v16 = vmul.f32 %v1106_v14, %v1106_v14  ;;  %v1108_v17 = vmul.f32 0.0078125, %v1104_v15  ;;  %v1114_v25 = vsub.f32 %v1094_v5, %v1106_v14 }
 0x3b6   : > { %1700 = vrsqrt.f32 %v1115_v33  ;;  %v1112_v34 = vsub.f32 %v1108_v17, %v1110_v16 }
 0x3b8   : > { %v1116_v18 = vadd.f32 1e-05, %v1112_v34 }
 0x3ba   : > { %1702 = vrsqrt.f32 %v1116_v18 }
 0x3c0   : > { %v1701_v20 = vpop.eup %1700 }
 0x3c1   : > { %v1119_v22 = vmul.f32 %v1701_v20, %v1113_v19 }
 0x3c3   : > { %v1128_v24 = vmul.f32 %v1423_v21, %v1119_v22 }
 0x3c4   : > { %v1703_v26 = vpop.eup %1702 }
 0x3c5   : > { %v1137_v27 = vadd.f32 %v1424_v23, %v1128_v24  ;;  %v1120_v28 = vmul.f32 %v1703_v26, %v1114_v25 }
 0x3c7   : > { %v1129_v29 = vmul.f32 %v1423_v21, %v1120_v28  ;;  %1139 = vst [vmem:[%s464_s4] sm:$0xff] %v1137_v27 }
 0x3c9   : > { %v1138_v30 = vadd.f32 %v1424_v23, %v1129_v29 }
 0x3cb   : > { %1140 = vst [vmem:[%s464_s4 + $0x8] sm:$0xff] %v1138_v30 }
 0x3cc   : > { %1945 = shalt.err (!%p1942_p5)
}
 0x3cd   : > { %s1946_s13 = scalar_lea.hbm %s2505_s24, 256  ;;  %s1950_s3 = scalar_lea.hbm %s2618_s19, 1024 }
 0x3ce   : > { %p1947_p11 = scmp.ne.s32.totalorder %s2505_s24, %s1946_s13  ;;  %p1951_p13 = scmp.lt.u32.totalorder %s2505_s24, %s2618_s19 }
 0x3cf   : > { %p1952_p2 = scmp.lt.u32.totalorder %s1950_s3, %s1946_s13  ;;  %p1954_p4 = scmp.lt.u32.totalorder %s1946_s13, %s2505_s24 }
 0x3d0   : > { %p1948_p3 = pnand %p1947_p11, %p2619_p10 }
 0x3d1   : > { %p1953_p0 = por %p1952_p2, %p1951_p13 }
 0x3d2   : > { %p1949_p12 = pneg %p1948_p3 }
 0x3d3   : > { %p1955_p6 = por %p1954_p4, %p1953_p0 }
 0x3d5   : > { %p1956_p8 = pnand %p1955_p6, %p1949_p12 }
 0x3d7   : > { %1959 = shalt.err (!%p1956_p8)
}
 0x3d8   : > { %s2066_s4 = smov 128   ;;  %s2067_s22 = smov 8  }
 0x3d9   : > { %1489 = dma.vmem_to_hbm [thread:$0]  (%p2619_p10), %s2507_s16, 256, %s2505_s24, %s1142_s6, %s2066_s4, %s2066_s4, %s2067_s22  }
 0x3da PF: > { %p1534_p9 = scmp.ge.s32.totalorder %s2050_s12, 2  ;;  %s1172_s0 = sand.u32 1, %s2022_s27  }
 0x3db   : > { %p2620_p1 = scmp.ne.s32.totalorder %s2601_s21, 0  ;;  %s1173_s2 = scalar_lea.sflag [#allocation6], %s1172_s0 }
 0x3dd   : > { %p1518_p7 = pnand %p1534_p9, %p2620_p1 }
 0x3df   : > { %2017 = dma.done.wait (!%p1518_p7), %s1173_s2, 256  }
 0x3e0   : > { %2019 = vsyncadd (!%p1518_p7), %s1173_s2, 4294967040  ;;  %s30_s12 = sadd.s32 1, %s2050_s12   ;;  %s2621_s27 = smov %s2026_s28 }
 0x3e1   : > { %p27_p5 = scmp.ge.s32.totalorder %s30_s12, 6   ;;  %s2622_s28 = smov %s2030_s29 }
 0x3e2   : > { %s2623_s29 = smov %s2354_s14  ;;  %s2624_s30 = smov %s2042_s10 }
 0x3e3   : > { %s2625_s9 = smov %s2046_s11  ;;  %s2626_s10 = smov %s2629_s17 }
 0x3e4   : > { %s2627_s11 = smov %s2633_s23  ;;  %29 = sbr.rel (!%p27_p5) target bundleno = 20 (0x14), region = 134 }
 0x3eb   :  { %1178 = vsyncpa [#allocation5], 1 }
 0x3ec   :  { %1180 = vsyncpa [#allocation5 + $0x1], 1 }
 0x3ed   :  { %1181 = vsyncpa [#allocation8], 1 }
 0x3ee   :  { %1183 = vsyncpa [#allocation8 + $0x1], 1 }
 0x3ef   :  { %1184 = vsyncpa [#allocation11], 1 }
 0x3f0   :  { %1185 = vsyncpa [#allocation14], 1 }
 0x3f1   :  { %1186 = vsyncpa [#allocation17], 1 }
 0x3f2   :  { %1187 = vsyncpa [#allocation6], 1 }
 0x3f3   :  { %1189 = vsyncpa [#allocation6 + $0x1], 1 }

</bundles_post_ra>
